<compile_context>
chip_gen: v6e
topology: v6e:2x2x1
jax: 0.10.0
libtpu: 0.0.40
codegen_flags: <defaults>
</compile_context>

<pallas_src>
import functools

import jax
import jax.numpy as jnp
from jax import lax
from jax.experimental import pallas as pl
from jax.experimental.pallas import tpu as pltpu

_NEG = -1e30  # additive validity mask; exact because ReLU+maxpool keeps pooled >= 0


def _round_up(x, m):
    return (x + m - 1) // m * m


def cnn_kernel(tok_ref, embed_ref, wconv_ref, biasmask_ref, wfc_ref, bfc_ref,
               out_ref, *, tb, s_tok, s_blk, kt_pad, fs_max, vocab_pad):
    """One batch tile (tb samples) per grid step.

    tok_ref      : (tb, s_tok) int32    zero-padded token ids (only streamed input)
    embed_ref    : (vocab_pad, E)       embedding table, VMEM-resident
    wconv_ref    : (fs_max, E, kt_pad)  packed conv weights, one slot per shift
    biasmask_ref : (s_blk, 1, kt_pad)   conv bias + (-1e30 on invalid positions)
    wfc_ref      : (1, kt_pad)          fused fc0 @ fc1 weight (row)
    bfc_ref      : (1, 1)               fused fc bias
    out_ref      : (1, 1, tb)           lane-dense scores for this batch tile
    """
    # In-kernel embedding gather: one-hot rows select table rows exactly on the
    # MXU.  Tokens stay lane-resident; per position only a (tb, 1) column is
    # broadcast across lanes, so there is no lane->sublane relayout anywhere.
    # TODO(synk): for long sequences turn this unrolled loop into a fori_loop
    # writing a VMEM scratch, and for large vocabularies replace the one-hot
    # matmul with a DMA gather from an HBM-resident table.
    lane_iota = lax.broadcasted_iota(jnp.int32, (tb, vocab_pad), 1)
    onehot = jnp.concatenate(
        [(tok_ref[:, t:t + 1] == lane_iota).astype(jnp.float32)
         for t in range(s_tok)],
        axis=0)                                              # (s_tok*tb, vocab_pad), time-major
    emb = jnp.dot(onehot, embed_ref[...],
                  preferred_element_type=jnp.float32)        # (s_tok*tb, E)

    # Conv(t) = sum_r emb[t+r] @ W[r].  Time-major layout makes every shift-r
    # window an 8-aligned sublane slice (offset r*tb), so the shift is folded
    # into the LHS of fs_max MXU matmuls with zero relayout/rotate cost.
    acc = None
    for r in range(fs_max):
        win = emb[r * tb:(r + s_blk) * tb, :]                # (s_blk*tb, E), aligned slice
        part = jnp.dot(win, wconv_ref[r],
                       preferred_element_type=jnp.float32)   # (s_blk*tb, kt_pad)
        acc = part if acc is None else acc + part

    # Bias + validity mask (invalid / padded windows -> -1e30), ReLU, max-pool
    # over time.  ReLU >= 0 makes the additive mask exact for the max-pool.
    act = jnp.maximum(acc.reshape(s_blk, tb, kt_pad) + biasmask_ref[...], 0.0)
    pooled = jnp.max(act, axis=0)                            # (tb, kt_pad)

    # Fused fc0->fc1: contract (1, kt_pad) against (tb, kt_pad) so the batch
    # lands on lanes and the output store is one full-width vst.
    score = lax.dot_general(wfc_ref[...], pooled,
                            dimension_numbers=(((1,), (1,)), ((), ())),
                            preferred_element_type=jnp.float32)  # (1, tb)
    out_ref[...] = (score + bfc_ref[...]).reshape(1, 1, tb)


def pack_cnn_params(params, *, filter_sizes, seq_len):
    """One-time packing of CNN parameters into kernel-friendly layouts.

    Hoisted out of the per-call path (perf review): call once per parameter
    set, then pass the result to cnn_forward for every batch.
    """
    embed = params["embed"].astype(jnp.float32)               # (V, E)
    vocab, e_dim = embed.shape
    n_kernel = params["conv_w"][0].shape[2]
    fs_max, fs_min = max(filter_sizes), min(filter_sizes)
    s = int(seq_len)
    s_out = s - fs_min + 1                                    # longest conv output
    s_blk = _round_up(s_out, 8)                               # 8-aligned pooled rows
    s_tok = s_blk + fs_max - 1                                # token window incl. shifts
    kt = len(filter_sizes) * n_kernel
    kt_pad = _round_up(kt, 128)                               # 128-lane filter slots
    vocab_pad = _round_up(vocab, 128)                         # lane-dense one-hot

    embed_p = jnp.zeros((vocab_pad, e_dim), jnp.float32).at[:vocab].set(embed)

    wconv = jnp.zeros((fs_max, e_dim, kt_pad), jnp.float32)
    biasmask = jnp.zeros((s_blk, 1, kt_pad), jnp.float32)
    for i, fs in enumerate(filter_sizes):
        w = params["conv_w"][i]                               # (fs, E, K)
        col = slice(i * n_kernel, (i + 1) * n_kernel)
        for r in range(fs):
            wconv = wconv.at[r, :, col].set(w[r])
        biasmask = biasmask.at[:, 0, col].set(
            jnp.broadcast_to(params["conv_b"][i], (s_blk, n_kernel)))
        biasmask = biasmask.at[s - fs + 1:, 0, col].set(_NEG)  # kill invalid windows

    # fc0 -> fc1 has no nonlinearity between them: fuse into one (1, kt) row.
    wfc_col = params["fc0_w"] @ params["fc1_w"]               # (kt, 1)
    wfc = jnp.zeros((1, kt_pad), jnp.float32).at[0, :kt].set(wfc_col[:, 0])
    bfc = (params["fc0_b"] @ params["fc1_w"] + params["fc1_b"]).reshape(1, 1)
    # TODO(synk): nn.Dropout is identity at inference; no mask applied.

    meta = dict(seq_len=s, s_blk=s_blk, s_tok=s_tok, kt_pad=kt_pad,
                vocab_pad=vocab_pad, fs_max=fs_max, e_dim=e_dim)
    return dict(embed=embed_p, wconv=wconv, biasmask=biasmask, wfc=wfc, bfc=bfc,
                meta=meta)


def cnn_forward(tokens, packed, *, block_b=256):
    """Forward matching CNN.forward in eval mode. Returns shape (B,)."""
    meta = packed["meta"]
    b, s = tokens.shape
    assert s == meta["seq_len"], "pack_cnn_params was built for a different seq_len"
    s_tok, s_blk = meta["s_tok"], meta["s_blk"]
    kt_pad, vocab_pad = meta["kt_pad"], meta["vocab_pad"]
    fs_max, e_dim = meta["fs_max"], meta["e_dim"]

    # Batch tiling: 8-aligned tiles.  When the whole batch fits one tile and is
    # large enough, split it in two so the ("parallel",) grid axis can span
    # v7x's two TensorCores.  tb is also the lane width of the output store.
    b_pad = _round_up(max(b, 1), 8)
    if b_pad > block_b:
        tb = block_b
    elif b_pad % 16 == 0:
        tb = b_pad // 2
    else:
        tb = b_pad
    b_pad = _round_up(b_pad, tb)
    num_tiles = b_pad // tb

    # Only int32 tokens are streamed (~s_tok*4 B/sample); padding the token
    # window (pad id 0) is ~free and every padded position is masked in-kernel.
    tok = jnp.pad(tokens.astype(jnp.int32), ((0, b_pad - b), (0, s_tok - s)))

    kernel = functools.partial(
        cnn_kernel, tb=tb, s_tok=s_tok, s_blk=s_blk, kt_pad=kt_pad,
        fs_max=fs_max, vocab_pad=vocab_pad)

    out = pl.pallas_call(
        kernel,
        out_shape=jax.ShapeDtypeStruct((num_tiles, 1, tb), jnp.float32),
        grid=(num_tiles,),
        in_specs=[
            pl.BlockSpec((tb, s_tok), lambda i: (i, 0)),              # streamed tokens
            pl.BlockSpec((vocab_pad, e_dim), lambda i: (0, 0)),       # resident table
            pl.BlockSpec((fs_max, e_dim, kt_pad), lambda i: (0, 0, 0)),
            pl.BlockSpec((s_blk, 1, kt_pad), lambda i: (0, 0, 0)),
            pl.BlockSpec((1, kt_pad), lambda i: (0, 0)),
            pl.BlockSpec((1, 1), lambda i: (0, 0)),
        ],
        out_specs=pl.BlockSpec((1, 1, tb), lambda i: (i, 0, 0)),
        compiler_params=pltpu.CompilerParams(
            dimension_semantics=("parallel",),
            vmem_limit_bytes=48 * 1024 * 1024),
    )(tok, packed["embed"], packed["wconv"], packed["biasmask"],
      packed["wfc"], packed["bfc"])

    # PyTorch's .squeeze() yields a 0-d tensor for B == 1; we always return (B,).
    return out.reshape(b_pad)[:b]


def init_params(key, *, vocab_size, embedding_dim, n_kernel, filter_sizes,
                hidden=500):
    keys = jax.random.split(key, 12)
    params = {}
    # nn.Embedding default init ~ N(0, 1)  (glove path unused: synthetic weights)
    params["embed"] = jax.random.normal(
        keys[0], (vocab_size, embedding_dim), jnp.float32)
    conv_w, conv_b = [], []
    for i, fs in enumerate(filter_sizes):
        # PyTorch Conv2d weight (K, 1, fs, E) -> stored as (fs, E, K)
        conv_w.append(0.1 * jax.random.normal(
            keys[1 + i], (fs, embedding_dim, n_kernel), jnp.float32))
        conv_b.append(0.1 * jax.random.normal(
            keys[4 + i], (1, n_kernel), jnp.float32))
    params["conv_w"] = conv_w
    params["conv_b"] = conv_b
    feat = len(filter_sizes) * n_kernel
    # PyTorch Linear weight (out, in) -> stored transposed (in, out)
    params["fc0_w"] = 0.1 * jax.random.normal(keys[7], (feat, hidden), jnp.float32)
    params["fc0_b"] = 0.1 * jax.random.normal(keys[8], (1, hidden), jnp.float32)
    params["fc1_w"] = 0.1 * jax.random.normal(keys[9], (hidden, 1), jnp.float32)
    params["fc1_b"] = 0.1 * jax.random.normal(keys[10], (1, 1), jnp.float32)
    return params


def ref_forward(tokens, params, *, filter_sizes):
    """Pure-JAX reference of the PyTorch forward (eval mode), unfused."""
    emb = params["embed"][tokens]          # (B, S, E)
    s = emb.shape[1]
    pools = []
    for f, fs in enumerate(filter_sizes):
        w, bias = params["conv_w"][f], params["conv_b"][f]
        s_out = s - fs + 1
        conv = jnp.stack(
            [jnp.einsum("bse,sek->bk", emb[:, t:t + fs, :], w)
             for t in range(s_out)], axis=1) + bias[None]
        conv = jnp.maximum(conv, 0.0)
        pools.append(conv.max(axis=1))     # (B, K)
    cat = jnp.concatenate(pools, axis=1)
    h = cat @ params["fc0_w"] + params["fc0_b"]
    out = h @ params["fc1_w"] + params["fc1_b"]
    return out.reshape(-1)


if __name__ == "__main__":
    # cfg: vocab_size=100, embedding_dim=32, n_kernel=8, filter_sizes=(3,4,5)
    VOCAB, E, K = 100, 32, 8
    FILTER_SIZES = (3, 4, 5)
    B, S = 2, 16

    key = jax.random.PRNGKey(0)
    k_tok, k_par = jax.random.split(key)
    tokens = jax.random.randint(k_tok, (B, S), 0, VOCAB, dtype=jnp.int32)
    params = init_params(k_par, vocab_size=VOCAB, embedding_dim=E,
                         n_kernel=K, filter_sizes=FILTER_SIZES)

    packed = pack_cnn_params(params, filter_sizes=FILTER_SIZES, seq_len=S)
    out = cnn_forward(tokens, packed)
    out = jax.block_until_ready(out)

    ref = ref_forward(tokens, params, filter_sizes=FILTER_SIZES)
    assert out.shape == (B,)
    assert jnp.allclose(out, ref, rtol=2e-3, atol=2e-3), (out, ref)

    print("KERNEL_OK")
</pallas_src>

<mosaic_0001>
module attributes {stable_mosaic.version = 11 : i64} {
  func.func @cnn_kernel(%arg0: i32, %arg1: memref<8x20xi32, #tpu.memory_space<vmem>>, %arg2: memref<128x32xf32, #tpu.memory_space<vmem>>, %arg3: memref<5x32x128xf32, #tpu.memory_space<vmem>>, %arg4: memref<16x1x128xf32, #tpu.memory_space<vmem>>, %arg5: memref<1x128xf32, #tpu.memory_space<vmem>>, %arg6: memref<1x1xf32, #tpu.memory_space<vmem>>, %arg7: memref<1x1x8xf32, #tpu.memory_space<vmem>>) attributes {dimension_semantics = [#tpu.dimension_semantics<parallel>], iteration_bounds = array<i64: 1>, scalar_prefetch = 0 : i64, scratch_operands = 0 : i64, tpu.core_type = #tpu.core_type<tc>, window_params = [{transform_indices = @transform_0, window_bounds = array<i64: 8, 20>}, {pipeline_mode = #tpu.pipeline_mode<synchronous>, transform_indices = @transform_1, window_bounds = array<i64: 128, 32>}, {pipeline_mode = #tpu.pipeline_mode<synchronous>, transform_indices = @transform_2, window_bounds = array<i64: 5, 32, 128>}, {pipeline_mode = #tpu.pipeline_mode<synchronous>, transform_indices = @transform_3, window_bounds = array<i64: 16, 1, 128>}, {pipeline_mode = #tpu.pipeline_mode<synchronous>, transform_indices = @transform_4, window_bounds = array<i64: 1, 128>}, {pipeline_mode = #tpu.pipeline_mode<synchronous>, transform_indices = @transform_5, window_bounds = array<i64: 1, 1>}, {transform_indices = @transform_6, window_bounds = array<i64: 1, 1, 8>}]} {
    %0 = tpu.iota {dimensions = array<i32: 1>} : vector<8x128xi32>
    %c0 = arith.constant 0 : index
    %c0_0 = arith.constant 0 : index
    %1 = vector.load %arg1[%c0, %c0_0] : memref<8x20xi32, #tpu.memory_space<vmem>>, vector<8x1xi32>
    %2 = vector.broadcast %1 : vector<8x1xi32> to vector<8x128xi32>
    %3 = arith.cmpi eq, %2, %0 : vector<8x128xi32>
    %4 = arith.extui %3 : vector<8x128xi1> to vector<8x128xi32>
    %5 = arith.sitofp %4 : vector<8x128xi32> to vector<8x128xf32>
    %c0_1 = arith.constant 0 : index
    %c1 = arith.constant 1 : index
    %6 = vector.load %arg1[%c0_1, %c1] : memref<8x20xi32, #tpu.memory_space<vmem>>, vector<8x1xi32>
    %7 = vector.broadcast %6 : vector<8x1xi32> to vector<8x128xi32>
    %8 = arith.cmpi eq, %7, %0 : vector<8x128xi32>
    %9 = arith.extui %8 : vector<8x128xi1> to vector<8x128xi32>
    %10 = arith.sitofp %9 : vector<8x128xi32> to vector<8x128xf32>
    %c0_2 = arith.constant 0 : index
    %c2 = arith.constant 2 : index
    %11 = vector.load %arg1[%c0_2, %c2] : memref<8x20xi32, #tpu.memory_space<vmem>>, vector<8x1xi32>
    %12 = vector.broadcast %11 : vector<8x1xi32> to vector<8x128xi32>
    %13 = arith.cmpi eq, %12, %0 : vector<8x128xi32>
    %14 = arith.extui %13 : vector<8x128xi1> to vector<8x128xi32>
    %15 = arith.sitofp %14 : vector<8x128xi32> to vector<8x128xf32>
    %c0_3 = arith.constant 0 : index
    %c3 = arith.constant 3 : index
    %16 = vector.load %arg1[%c0_3, %c3] : memref<8x20xi32, #tpu.memory_space<vmem>>, vector<8x1xi32>
    %17 = vector.broadcast %16 : vector<8x1xi32> to vector<8x128xi32>
    %18 = arith.cmpi eq, %17, %0 : vector<8x128xi32>
    %19 = arith.extui %18 : vector<8x128xi1> to vector<8x128xi32>
    %20 = arith.sitofp %19 : vector<8x128xi32> to vector<8x128xf32>
    %c0_4 = arith.constant 0 : index
    %c4 = arith.constant 4 : index
    %21 = vector.load %arg1[%c0_4, %c4] : memref<8x20xi32, #tpu.memory_space<vmem>>, vector<8x1xi32>
    %22 = vector.broadcast %21 : vector<8x1xi32> to vector<8x128xi32>
    %23 = arith.cmpi eq, %22, %0 : vector<8x128xi32>
    %24 = arith.extui %23 : vector<8x128xi1> to vector<8x128xi32>
    %25 = arith.sitofp %24 : vector<8x128xi32> to vector<8x128xf32>
    %c0_5 = arith.constant 0 : index
    %c5 = arith.constant 5 : index
    %26 = vector.load %arg1[%c0_5, %c5] : memref<8x20xi32, #tpu.memory_space<vmem>>, vector<8x1xi32>
    %27 = vector.broadcast %26 : vector<8x1xi32> to vector<8x128xi32>
    %28 = arith.cmpi eq, %27, %0 : vector<8x128xi32>
    %29 = arith.extui %28 : vector<8x128xi1> to vector<8x128xi32>
    %30 = arith.sitofp %29 : vector<8x128xi32> to vector<8x128xf32>
    %c0_6 = arith.constant 0 : index
    %c6 = arith.constant 6 : index
    %31 = vector.load %arg1[%c0_6, %c6] : memref<8x20xi32, #tpu.memory_space<vmem>>, vector<8x1xi32>
    %32 = vector.broadcast %31 : vector<8x1xi32> to vector<8x128xi32>
    %33 = arith.cmpi eq, %32, %0 : vector<8x128xi32>
    %34 = arith.extui %33 : vector<8x128xi1> to vector<8x128xi32>
    %35 = arith.sitofp %34 : vector<8x128xi32> to vector<8x128xf32>
    %c0_7 = arith.constant 0 : index
    %c7 = arith.constant 7 : index
    %36 = vector.load %arg1[%c0_7, %c7] : memref<8x20xi32, #tpu.memory_space<vmem>>, vector<8x1xi32>
    %37 = vector.broadcast %36 : vector<8x1xi32> to vector<8x128xi32>
    %38 = arith.cmpi eq, %37, %0 : vector<8x128xi32>
    %39 = arith.extui %38 : vector<8x128xi1> to vector<8x128xi32>
    %40 = arith.sitofp %39 : vector<8x128xi32> to vector<8x128xf32>
    %c0_8 = arith.constant 0 : index
    %c8 = arith.constant 8 : index
    %41 = vector.load %arg1[%c0_8, %c8] : memref<8x20xi32, #tpu.memory_space<vmem>>, vector<8x1xi32>
    %42 = vector.broadcast %41 : vector<8x1xi32> to vector<8x128xi32>
    %43 = arith.cmpi eq, %42, %0 : vector<8x128xi32>
    %44 = arith.extui %43 : vector<8x128xi1> to vector<8x128xi32>
    %45 = arith.sitofp %44 : vector<8x128xi32> to vector<8x128xf32>
    %c0_9 = arith.constant 0 : index
    %c9 = arith.constant 9 : index
    %46 = vector.load %arg1[%c0_9, %c9] : memref<8x20xi32, #tpu.memory_space<vmem>>, vector<8x1xi32>
    %47 = vector.broadcast %46 : vector<8x1xi32> to vector<8x128xi32>
    %48 = arith.cmpi eq, %47, %0 : vector<8x128xi32>
    %49 = arith.extui %48 : vector<8x128xi1> to vector<8x128xi32>
    %50 = arith.sitofp %49 : vector<8x128xi32> to vector<8x128xf32>
    %c0_10 = arith.constant 0 : index
    %c10 = arith.constant 10 : index
    %51 = vector.load %arg1[%c0_10, %c10] : memref<8x20xi32, #tpu.memory_space<vmem>>, vector<8x1xi32>
    %52 = vector.broadcast %51 : vector<8x1xi32> to vector<8x128xi32>
    %53 = arith.cmpi eq, %52, %0 : vector<8x128xi32>
    %54 = arith.extui %53 : vector<8x128xi1> to vector<8x128xi32>
    %55 = arith.sitofp %54 : vector<8x128xi32> to vector<8x128xf32>
    %c0_11 = arith.constant 0 : index
    %c11 = arith.constant 11 : index
    %56 = vector.load %arg1[%c0_11, %c11] : memref<8x20xi32, #tpu.memory_space<vmem>>, vector<8x1xi32>
    %57 = vector.broadcast %56 : vector<8x1xi32> to vector<8x128xi32>
    %58 = arith.cmpi eq, %57, %0 : vector<8x128xi32>
    %59 = arith.extui %58 : vector<8x128xi1> to vector<8x128xi32>
    %60 = arith.sitofp %59 : vector<8x128xi32> to vector<8x128xf32>
    %c0_12 = arith.constant 0 : index
    %c12 = arith.constant 12 : index
    %61 = vector.load %arg1[%c0_12, %c12] : memref<8x20xi32, #tpu.memory_space<vmem>>, vector<8x1xi32>
    %62 = vector.broadcast %61 : vector<8x1xi32> to vector<8x128xi32>
    %63 = arith.cmpi eq, %62, %0 : vector<8x128xi32>
    %64 = arith.extui %63 : vector<8x128xi1> to vector<8x128xi32>
    %65 = arith.sitofp %64 : vector<8x128xi32> to vector<8x128xf32>
    %c0_13 = arith.constant 0 : index
    %c13 = arith.constant 13 : index
    %66 = vector.load %arg1[%c0_13, %c13] : memref<8x20xi32, #tpu.memory_space<vmem>>, vector<8x1xi32>
    %67 = vector.broadcast %66 : vector<8x1xi32> to vector<8x128xi32>
    %68 = arith.cmpi eq, %67, %0 : vector<8x128xi32>
    %69 = arith.extui %68 : vector<8x128xi1> to vector<8x128xi32>
    %70 = arith.sitofp %69 : vector<8x128xi32> to vector<8x128xf32>
    %c0_14 = arith.constant 0 : index
    %c14 = arith.constant 14 : index
    %71 = vector.load %arg1[%c0_14, %c14] : memref<8x20xi32, #tpu.memory_space<vmem>>, vector<8x1xi32>
    %72 = vector.broadcast %71 : vector<8x1xi32> to vector<8x128xi32>
    %73 = arith.cmpi eq, %72, %0 : vector<8x128xi32>
    %74 = arith.extui %73 : vector<8x128xi1> to vector<8x128xi32>
    %75 = arith.sitofp %74 : vector<8x128xi32> to vector<8x128xf32>
    %c0_15 = arith.constant 0 : index
    %c15 = arith.constant 15 : index
    %76 = vector.load %arg1[%c0_15, %c15] : memref<8x20xi32, #tpu.memory_space<vmem>>, vector<8x1xi32>
    %77 = vector.broadcast %76 : vector<8x1xi32> to vector<8x128xi32>
    %78 = arith.cmpi eq, %77, %0 : vector<8x128xi32>
    %79 = arith.extui %78 : vector<8x128xi1> to vector<8x128xi32>
    %80 = arith.sitofp %79 : vector<8x128xi32> to vector<8x128xf32>
    %c0_16 = arith.constant 0 : index
    %c16 = arith.constant 16 : index
    %81 = vector.load %arg1[%c0_16, %c16] : memref<8x20xi32, #tpu.memory_space<vmem>>, vector<8x1xi32>
    %82 = vector.broadcast %81 : vector<8x1xi32> to vector<8x128xi32>
    %83 = arith.cmpi eq, %82, %0 : vector<8x128xi32>
    %84 = arith.extui %83 : vector<8x128xi1> to vector<8x128xi32>
    %85 = arith.sitofp %84 : vector<8x128xi32> to vector<8x128xf32>
    %c0_17 = arith.constant 0 : index
    %c17 = arith.constant 17 : index
    %86 = vector.load %arg1[%c0_17, %c17] : memref<8x20xi32, #tpu.memory_space<vmem>>, vector<8x1xi32>
    %87 = vector.broadcast %86 : vector<8x1xi32> to vector<8x128xi32>
    %88 = arith.cmpi eq, %87, %0 : vector<8x128xi32>
    %89 = arith.extui %88 : vector<8x128xi1> to vector<8x128xi32>
    %90 = arith.sitofp %89 : vector<8x128xi32> to vector<8x128xf32>
    %c0_18 = arith.constant 0 : index
    %c18 = arith.constant 18 : index
    %91 = vector.load %arg1[%c0_18, %c18] : memref<8x20xi32, #tpu.memory_space<vmem>>, vector<8x1xi32>
    %92 = vector.broadcast %91 : vector<8x1xi32> to vector<8x128xi32>
    %93 = arith.cmpi eq, %92, %0 : vector<8x128xi32>
    %94 = arith.extui %93 : vector<8x128xi1> to vector<8x128xi32>
    %95 = arith.sitofp %94 : vector<8x128xi32> to vector<8x128xf32>
    %c0_19 = arith.constant 0 : index
    %c19 = arith.constant 19 : index
    %96 = vector.load %arg1[%c0_19, %c19] : memref<8x20xi32, #tpu.memory_space<vmem>>, vector<8x1xi32>
    %97 = vector.broadcast %96 : vector<8x1xi32> to vector<8x128xi32>
    %98 = arith.cmpi eq, %97, %0 : vector<8x128xi32>
    %99 = arith.extui %98 : vector<8x128xi1> to vector<8x128xi32>
    %100 = arith.sitofp %99 : vector<8x128xi32> to vector<8x128xf32>
    %101 = tpu.concatenate %5, %10, %15, %20, %25, %30, %35, %40, %45, %50, %55, %60, %65, %70, %75, %80 in 0 : vector<8x128xf32>, vector<8x128xf32>, vector<8x128xf32>, vector<8x128xf32>, vector<8x128xf32>, vector<8x128xf32>, vector<8x128xf32>, vector<8x128xf32>, vector<8x128xf32>, vector<8x128xf32>, vector<8x128xf32>, vector<8x128xf32>, vector<8x128xf32>, vector<8x128xf32>, vector<8x128xf32>, vector<8x128xf32> -> vector<128x128xf32>
    %102 = tpu.concatenate %85, %90, %95, %100 in 0 : vector<8x128xf32>, vector<8x128xf32>, vector<8x128xf32>, vector<8x128xf32> -> vector<32x128xf32>
    %103 = tpu.concatenate %101, %102 in 0 : vector<128x128xf32>, vector<32x128xf32> -> vector<160x128xf32>
    %c0_20 = arith.constant 0 : index
    %c0_21 = arith.constant 0 : index
    %104 = vector.load %arg2[%c0_20, %c0_21] : memref<128x32xf32, #tpu.memory_space<vmem>>, vector<128x32xf32>
    %cst = arith.constant dense<0.000000e+00> : vector<160x32xf32>
    %105 = tpu.matmul %103, %104, %cst {dimension_numbers = #tpu.dot_dimension_numbers<[1], [0], [0], [1], [0, 0, 1, 1], [], []>} : vector<160x128xf32>, vector<128x32xf32>, vector<160x32xf32> -> vector<160x32xf32>
    %106 = vector.extract_strided_slice %105 {offsets = [0, 0], sizes = [128, 32], strides = [1, 1]} : vector<160x32xf32> to vector<128x32xf32>
    %c0_22 = arith.constant 0 : index
    %c0_23 = arith.constant 0 : index
    %c0_24 = arith.constant 0 : index
    %107 = vector.load %arg3[%c0_22, %c0_23, %c0_24] : memref<5x32x128xf32, #tpu.memory_space<vmem>>, vector<1x32x128xf32>
    %108 = vector.shape_cast %107 : vector<1x32x128xf32> to vector<32x128xf32>
    %cst_25 = arith.constant dense<0.000000e+00> : vector<128x128xf32>
    %109 = tpu.matmul %106, %108, %cst_25 {dimension_numbers = #tpu.dot_dimension_numbers<[1], [0], [0], [1], [0, 0, 1, 1], [], []>} : vector<128x32xf32>, vector<32x128xf32>, vector<128x128xf32> -> vector<128x128xf32>
    %110 = vector.extract_strided_slice %105 {offsets = [8, 0], sizes = [128, 32], strides = [1, 1]} : vector<160x32xf32> to vector<128x32xf32>
    %c1_26 = arith.constant 1 : index
    %c0_27 = arith.constant 0 : index
    %c0_28 = arith.constant 0 : index
    %111 = vector.load %arg3[%c1_26, %c0_27, %c0_28] : memref<5x32x128xf32, #tpu.memory_space<vmem>>, vector<1x32x128xf32>
    %112 = vector.shape_cast %111 : vector<1x32x128xf32> to vector<32x128xf32>
    %cst_29 = arith.constant dense<0.000000e+00> : vector<128x128xf32>
    %113 = tpu.matmul %110, %112, %cst_29 {dimension_numbers = #tpu.dot_dimension_numbers<[1], [0], [0], [1], [0, 0, 1, 1], [], []>} : vector<128x32xf32>, vector<32x128xf32>, vector<128x128xf32> -> vector<128x128xf32>
    %114 = arith.addf %109, %113 : vector<128x128xf32>
    %115 = vector.extract_strided_slice %105 {offsets = [16, 0], sizes = [128, 32], strides = [1, 1]} : vector<160x32xf32> to vector<128x32xf32>
    %c2_30 = arith.constant 2 : index
    %c0_31 = arith.constant 0 : index
    %c0_32 = arith.constant 0 : index
    %116 = vector.load %arg3[%c2_30, %c0_31, %c0_32] : memref<5x32x128xf32, #tpu.memory_space<vmem>>, vector<1x32x128xf32>
    %117 = vector.shape_cast %116 : vector<1x32x128xf32> to vector<32x128xf32>
    %cst_33 = arith.constant dense<0.000000e+00> : vector<128x128xf32>
    %118 = tpu.matmul %115, %117, %cst_33 {dimension_numbers = #tpu.dot_dimension_numbers<[1], [0], [0], [1], [0, 0, 1, 1], [], []>} : vector<128x32xf32>, vector<32x128xf32>, vector<128x128xf32> -> vector<128x128xf32>
    %119 = arith.addf %114, %118 : vector<128x128xf32>
    %120 = vector.extract_strided_slice %105 {offsets = [24, 0], sizes = [128, 32], strides = [1, 1]} : vector<160x32xf32> to vector<128x32xf32>
    %c3_34 = arith.constant 3 : index
    %c0_35 = arith.constant 0 : index
    %c0_36 = arith.constant 0 : index
    %121 = vector.load %arg3[%c3_34, %c0_35, %c0_36] : memref<5x32x128xf32, #tpu.memory_space<vmem>>, vector<1x32x128xf32>
    %122 = vector.shape_cast %121 : vector<1x32x128xf32> to vector<32x128xf32>
    %cst_37 = arith.constant dense<0.000000e+00> : vector<128x128xf32>
    %123 = tpu.matmul %120, %122, %cst_37 {dimension_numbers = #tpu.dot_dimension_numbers<[1], [0], [0], [1], [0, 0, 1, 1], [], []>} : vector<128x32xf32>, vector<32x128xf32>, vector<128x128xf32> -> vector<128x128xf32>
    %124 = arith.addf %119, %123 : vector<128x128xf32>
    %125 = vector.extract_strided_slice %105 {offsets = [32, 0], sizes = [128, 32], strides = [1, 1]} : vector<160x32xf32> to vector<128x32xf32>
    %c4_38 = arith.constant 4 : index
    %c0_39 = arith.constant 0 : index
    %c0_40 = arith.constant 0 : index
    %126 = vector.load %arg3[%c4_38, %c0_39, %c0_40] : memref<5x32x128xf32, #tpu.memory_space<vmem>>, vector<1x32x128xf32>
    %127 = vector.shape_cast %126 : vector<1x32x128xf32> to vector<32x128xf32>
    %cst_41 = arith.constant dense<0.000000e+00> : vector<128x128xf32>
    %128 = tpu.matmul %125, %127, %cst_41 {dimension_numbers = #tpu.dot_dimension_numbers<[1], [0], [0], [1], [0, 0, 1, 1], [], []>} : vector<128x32xf32>, vector<32x128xf32>, vector<128x128xf32> -> vector<128x128xf32>
    %129 = arith.addf %124, %128 : vector<128x128xf32>
    %130 = vector.shape_cast %129 : vector<128x128xf32> to vector<16x8x128xf32>
    %c0_42 = arith.constant 0 : index
    %c0_43 = arith.constant 0 : index
    %c0_44 = arith.constant 0 : index
    %131 = vector.load %arg4[%c0_42, %c0_43, %c0_44] : memref<16x1x128xf32, #tpu.memory_space<vmem>>, vector<16x1x128xf32>
    %132 = vector.broadcast %131 : vector<16x1x128xf32> to vector<16x8x128xf32>
    %133 = arith.addf %130, %132 : vector<16x8x128xf32>
    %cst_45 = arith.constant 0.000000e+00 : f32
    %134 = vector.broadcast %cst_45 : f32 to vector<16x8x128xf32>
    %135 = arith.maximumf %133, %134 : vector<16x8x128xf32>
    %cst_46 = arith.constant dense<0xFF800000> : vector<8x128xf32>
    %136 = vector.multi_reduction <maximumf>, %135, %cst_46 [0] : vector<16x8x128xf32> to vector<8x128xf32>
    %c0_47 = arith.constant 0 : index
    %c0_48 = arith.constant 0 : index
    %137 = vector.load %arg5[%c0_47, %c0_48] : memref<1x128xf32, #tpu.memory_space<vmem>>, vector<1x128xf32>
    %cst_49 = arith.constant dense<0.000000e+00> : vector<1x8xf32>
    %138 = tpu.matmul %137, %136, %cst_49 {dimension_numbers = #tpu.dot_dimension_numbers<[1], [1], [0], [0], [0, 0, 1, 0], [], []>} : vector<1x128xf32>, vector<8x128xf32>, vector<1x8xf32> -> vector<1x8xf32>
    %c0_50 = arith.constant 0 : index
    %c0_51 = arith.constant 0 : index
    %139 = vector.load %arg6[%c0_50, %c0_51] : memref<1x1xf32, #tpu.memory_space<vmem>>, vector<1x1xf32>
    %140 = vector.broadcast %139 : vector<1x1xf32> to vector<1x8xf32>
    %141 = arith.addf %138, %140 : vector<1x8xf32>
    %142 = vector.shape_cast %141 : vector<1x8xf32> to vector<1x1x8xf32>
    %c0_52 = arith.constant 0 : index
    %c0_53 = arith.constant 0 : index
    %c0_54 = arith.constant 0 : index
    %143 = vector.load %arg7[%c0_52, %c0_53, %c0_54] : memref<1x1x8xf32, #tpu.memory_space<vmem>>, vector<1x1x8xf32>
    tpu.vector_store %arg7[%c0_52, %c0_53, %c0_54], %142 {strides = array<i32>} : memref<1x1x8xf32, #tpu.memory_space<vmem>>, vector<1x1x8xf32>,
    return
  }
  func.func @transform_0(%arg0: i32) -> (i32, i32) {
    %c0_i32 = arith.constant 0 : i32
    %c0_i32_0 = arith.constant 0 : i32
    return %arg0, %c0_i32 : i32, i32
  }
  func.func @transform_1(%arg0: i32) -> (i32, i32) {
    %c0_i32 = arith.constant 0 : i32
    %c0_i32_0 = arith.constant 0 : i32
    %c0_i32_1 = arith.constant 0 : i32
    return %c0_i32, %c0_i32_0 : i32, i32
  }
  func.func @transform_2(%arg0: i32) -> (i32, i32, i32) {
    %c0_i32 = arith.constant 0 : i32
    %c0_i32_0 = arith.constant 0 : i32
    %c0_i32_1 = arith.constant 0 : i32
    %c0_i32_2 = arith.constant 0 : i32
    return %c0_i32, %c0_i32_0, %c0_i32_1 : i32, i32, i32
  }
  func.func @transform_3(%arg0: i32) -> (i32, i32, i32) {
    %c0_i32 = arith.constant 0 : i32
    %c0_i32_0 = arith.constant 0 : i32
    %c0_i32_1 = arith.constant 0 : i32
    %c0_i32_2 = arith.constant 0 : i32
    return %c0_i32, %c0_i32_0, %c0_i32_1 : i32, i32, i32
  }
  func.func @transform_4(%arg0: i32) -> (i32, i32) {
    %c0_i32 = arith.constant 0 : i32
    %c0_i32_0 = arith.constant 0 : i32
    %c0_i32_1 = arith.constant 0 : i32
    return %c0_i32, %c0_i32_0 : i32, i32
  }
  func.func @transform_5(%arg0: i32) -> (i32, i32) {
    %c0_i32 = arith.constant 0 : i32
    %c0_i32_0 = arith.constant 0 : i32
    %c0_i32_1 = arith.constant 0 : i32
    return %c0_i32, %c0_i32_0 : i32, i32
  }
  func.func @transform_6(%arg0: i32) -> (i32, i32, i32) {
    %c0_i32 = arith.constant 0 : i32
    %c0_i32_0 = arith.constant 0 : i32
    %c0_i32_1 = arith.constant 0 : i32
    return %arg0, %c0_i32, %c0_i32_0 : i32, i32, i32
  }
}

</mosaic_0001>

<bundles_post_ra>
// kernel: tpu_custom_call.1
= control target key start
LH: loop header
LB: loop body
LE: loop exit
PB: predicated region body
PF: predicated region fallthrough
CT: control target
= control target key end

     0   :  { %s2631_s0 = inlined_call_operand.hbm [shape: s32[8,20], index: 0, kind: input, shape index: {}]   ;;  %s2632_s1 = inlined_call_operand.vmem [shape: f32[128,32], index: 1, kind: input, shape index: {}]   ;;  %s2633_s2 = inlined_call_operand.vmem [shape: f32[5,32,128], index: 2, kind: input, shape index: {}]   ;;  %s2634_s3 = inlined_call_operand.hbm [shape: f32[16,1,128], index: 3, kind: input, shape index: {}]   ;;  %s2635_s4 = inlined_call_operand.vmem [shape: f32[1,128], index: 4, kind: input, shape index: {}]   ;;  %s2636_s5 = inlined_call_operand.<no memory space> [shape: f32[1,1], index: 5, kind: input, shape index: {}]   ;;  %s2637_s6 = inlined_call_operand.hbm [shape: f32[1,1,8], index: 6, kind: output, shape index: {}]  }
   0x1   :  { %v11_v0 = vstv %s2636_s5 }
   0x2   :  { %12 = vst [vmem:[#allocation2] sm:$0x1] %v11_v0 }
   0x3   :  { %13 = vsyncpa [#allocation4], 0 }
   0x4   :  { %14 = vsyncpa [#allocation7], 0 }
   0x5   :  { %15 = vsyncpa [#allocation5], 0  ;;  %s2112_s23 = smov [#allocation3]   ;;  %s2113_s25 = smov [#allocation6]  }
   0x6   :  { %s22_s24 = sshll.u32 %s2112_s23, 4  ;;  %s35_s26 = sshll.u32 %s2113_s25, 4  ;;  %s23_s24 = int_to_ptr.vmem [resolvable:$true] %s22_s24  ;;  %s36_s26 = int_to_ptr.vmem [resolvable:$true] %s35_s26 }
   0x7   :  { %s2054_s27 = scalar_lea.vmem %s23_s24, 128  ;;  %p2059_p1 = scmp.lt.s32.totalorder %s23_s24, %s23_s24 }
   0x8   :  { %p2055_p0 = scmp.ne.s32.totalorder %s23_s24, %s2054_s27  ;;  %p2060_p2 = scmp.lt.s32.totalorder %s2054_s27, %s2054_s27 }
   0xa   :  { %p2061_p3 = por %p2060_p2, %p2059_p1 }
   0xc   :  { %p2062_p4 = pnand %p2061_p3, %p2055_p0 }
   0xe   :  { %2065 = shalt.err (!%p2062_p4)
}
   0xf   :  { %25 = dma.hbm_to_vmem [thread:$0]  %s2631_s0, 128, %s23_s24, [#allocation4]  }
  0x10   :  { %s2074_s5 = scalar_lea.vmem %s36_s26, 256  ;;  %p2079_p6 = scmp.lt.s32.totalorder %s36_s26, %s36_s26 }
  0x11   :  { %p2075_p5 = scmp.ne.s32.totalorder %s36_s26, %s2074_s5  ;;  %p2080_p7 = scmp.lt.s32.totalorder %s2074_s5, %s2074_s5 }
  0x13   :  { %p2081_p8 = por %p2080_p7, %p2079_p6 }
  0x15   :  { %p2082_p9 = pnand %p2081_p8, %p2075_p5 }
  0x17   :  { %2085 = shalt.err (!%p2082_p9)
}
  0x18   :  { %s2114_s30 = smov 16   ;;  %s2115_s7 = smov 1  }
  0x19   :  { %41 = dma.hbm_to_vmem [thread:$0]  %s2634_s3, 256, %s36_s26, [#allocation7], %s2114_s30, %s2114_s30, %s2115_s7  }
  0x1a   :  { %2106 = dma.done.wait [#allocation4], 128  }
  0x1b   :  { %2107 = vsyncadd [#allocation4], 4294967168 }
  0x1c   :  { %2108 = dma.done.wait [#allocation7], 256  }
  0x1d   :  { %2109 = vsyncadd [#allocation7], 4294967040  ;;  %v2116_v1 = vmov 2   ;;  %v2117_v2 = vmov 0   ;;  %v2185_v3 = vld [vmem:[#allocation3] sm:$0xff]  ;;  %v190_v4 = vld [vmem:[%s2632_s1 + $0x78] sm:$0xff]  ;;  %v2638_v39 = vlaneseq }
  0x1e   :  { %2027 = vset.pattern.permute.xlu1 %v2116_v1  ;;  %2025 = vset.pattern.permute.xlu0 %v2117_v2  ;;  %v189_v5 = vld [vmem:[%s2632_s1 + $0x70] sm:$0xff]  ;;  %v2118_v6 = vmov 3   ;;  %v2119_v7 = vmov 1   ;;  %v188_v8 = vld [vmem:[%s2632_s1 + $0x68] sm:$0xff]  ;;  %v187_v9 = vld [vmem:[%s2632_s1 + $0x60] sm:$0xff]  ;;  %v2120_v10 = vmov 4  }
  0x1f   :  { %68 = vperm.xlu1 %2027, %v2185_v3   ;;  %56 = vperm.xlu0 %2025, %v2185_v3   ;;  %v2121_v11 = vmov 5   ;;  %v186_v12 = vld [vmem:[%s2632_s1 + $0x58] sm:$0xff]  ;;  %v2122_v13 = vmov 6   ;;  %v2123_v14 = vmov 8   ;;  %v185_v15 = vld [vmem:[%s2632_s1 + $0x50] sm:$0xff]  ;;  %v184_v16 = vld [vmem:[%s2632_s1 + $0x48] sm:$0xff] }
  0x20   :  { %1762 = vmatprep.subr.mxu0 %v190_v4  ;;  %v2124_v17 = vmov 7   ;;  %v2125_v18 = vmov 11   ;;  %v183_v19 = vld [vmem:[%s2632_s1 + $0x40] sm:$0xff]  ;;  %v2126_v20 = vmov 9   ;;  %v2127_v21 = vmov 14   ;;  %v182_v22 = vld [vmem:[%s2632_s1 + $0x38] sm:$0xff] }
  0x21   :  { %1763 = vmatpush3.msra.mxu0 %v190_v4  ;;  %v181_v23 = vld [vmem:[%s2632_s1 + $0x30] sm:$0xff]  ;;  %v2128_v24 = vmov 10   ;;  %v2129_v25 = vmov 17   ;;  %v180_v26 = vld [vmem:[%s2632_s1 + $0x28] sm:$0xff]  ;;  %v179_v27 = vld [vmem:[%s2632_s1 + $0x20] sm:$0xff]  ;;  %v2130_v28 = vmov 12  }
  0x22   :  { %1764 = vmatprep.subr.mxu0 %v189_v5  ;;  %v178_v29 = vld [vmem:[%s2632_s1 + $0x18] sm:$0xff]  ;;  %v177_v30 = vld [vmem:[%s2632_s1 + $0x10] sm:$0xff]  ;;  %v176_v31 = vld [vmem:[%s2632_s1 + $0x8] sm:$0xff]  ;;  %v2131_v32 = vmov 13   ;;  %v2132_v34 = vmov 15   ;;  %v2133_v35 = vmov 16  }
  0x23   :  { %2028 = vset.pattern.permute.xlu1 %v2118_v6  ;;  %2026 = vset.pattern.permute.xlu0 %v2119_v7  ;;  %v175_v33 = vld [vmem:[%s2632_s1] sm:$0xff]  ;;  %v2134_v36 = vmov 18   ;;  %v1515_v37 = vld [vmem:[%s2633_s2 + $0x38] sm:$0xff]  ;;  %v2135_v38 = vmov 19   ;;  %v53_v40 = vand.u32 127, %v2638_v39  ;;  %v2136_v43 = vmov 1.0  }
  0x24   :  { %74 = vperm.xlu1 %2028, %v2185_v3   ;;  %62 = vperm.xlu0 %2026, %v2185_v3   ;;  %v2263_v62 = vld [vmem:[%s2633_s2 + $0x58] sm:$0xff]  ;;  %v1514_v63 = vld [vmem:[%s2633_s2 + $0x30] sm:$0xff]  ;;  %v1513_v1 = vld [vmem:[%s2633_s2 + $0x28] sm:$0xff]  ;;  %s2139_s25 = smov [#allocation8]  }
  0x25   :  { %1765 = vmatpush3.msra.mxu0 %v189_v5  ;;  %1824 = vmatprep.subr.mxu1 %v1515_v37  ;;  %v2273_v0 = vld [vmem:[%s2633_s2 + $0x50] sm:$0xff]  ;;  %v2293_v4 = vld [vmem:[%s2633_s2 + $0x40] sm:$0xff]  ;;  %v1591_v5 = vld [vmem:[%s2633_s2 + $0x98] sm:$0xff]  ;;  %s1462_s26 = sshll.u32 %s2139_s25, 4  ;;  %s1463_s26 = int_to_ptr.vmem [resolvable:$true] %s1462_s26 }
  0x26   :  { %1766 = vmatprep.subr.mxu0 %v188_v8  ;;  %1825 = vmatpush3.msra.mxu1 %v1515_v37  ;;  %v359_v6 = vld [vmem:[%s2633_s2 + $0x18] sm:$0xff]  ;;  %s2086_s27 = scalar_lea.vmem %s1463_s26, 16  ;;  %s2090_s28 = scalar_lea.vmem %s1463_s26, 32 }
  0x27   :  { %1767 = vmatpush3.msra.mxu0 %v188_v8  ;;  %1826 = vmatprep.subr.mxu1 %v1514_v63  ;;  %p2087_p10 = scmp.ne.s32.totalorder %s1463_s26, %s2086_s27  ;;  %p2091_p11 = scmp.lt.s32.totalorder %s1463_s26, %s1463_s26 }
  0x28   :  { %2029 = vset.pattern.permute.xlu1 %v2120_v10  ;;  %2030 = vset.pattern.permute.xlu0 %v2121_v11  ;;  %v1590_v11 = vld [vmem:[%s2633_s2 + $0x90] sm:$0xff]  ;;  %p2092_p12 = scmp.lt.s32.totalorder %s2090_s28, %s2086_s27 }
  0x29   :  { %80 = vperm.xlu1 %2029, %v2185_v3   ;;  %86 = vperm.xlu0 %2030, %v2185_v3  }
  0x2a   :  { %1768 = vmatprep.subr.mxu0 %v187_v9  ;;  %1827 = vmatpush3.msra.mxu1 %v1514_v63  ;;  %p2093_p13 = por %p2092_p12, %p2091_p11 }
  0x2b   :  { %1769 = vmatpush3.msra.mxu0 %v187_v9  ;;  %1828 = vmatprep.subr.mxu1 %v1513_v1 }
  0x2c   :  { %1770 = vmatprep.subr.mxu0 %v186_v12  ;;  %1829 = vmatpush3.msra.mxu1 %v1513_v1  ;;  %p2094_p0 = pnand %p2093_p13, %p2087_p10 }
  0x2d   :  { %2031 = vset.pattern.permute.xlu1 %v2122_v13  ;;  %2033 = vset.pattern.permute.xlu0 %v2123_v14 }
  0x2e   :  { %92 = vperm.xlu1 %2031, %v2185_v3   ;;  %104 = vperm.xlu0 %2033, %v2185_v3  }
  0x2f   :  { %1771 = vmatpush3.msra.mxu0 %v186_v12  ;;  %v358_v12 = vld [vmem:[%s2633_s2 + $0x10] sm:$0xff] }
  0x30   :  { %1772 = vmatprep.subr.mxu0 %v185_v15 }
  0x31   :  { %1773 = vmatpush3.msra.mxu0 %v185_v15  ;;  %v1589_v15 = vld [vmem:[%s2633_s2 + $0x88] sm:$0xff] }
  0x32   :  { %2032 = vset.pattern.permute.xlu1 %v2124_v17  ;;  %2036 = vset.pattern.permute.xlu0 %v2125_v18  ;;  %v1588_v17 = vld [vmem:[%s2633_s2 + $0x80] sm:$0xff] }
  0x33   :  { %98 = vperm.xlu1 %2032, %v2185_v3   ;;  %122 = vperm.xlu0 %2036, %v2185_v3   ;;  %v356_v18 = vld [vmem:[%s2633_s2] sm:$0xff] }
  0x34   :  { %1774 = vmatprep.subr.mxu0 %v184_v16 }
  0x35   :  { %1775 = vmatpush3.msra.mxu0 %v184_v16  ;;  %v357_v16 = vld [vmem:[%s2633_s2 + $0x8] sm:$0xff] }
  0x36   :  { %1776 = vmatprep.subr.mxu0 %v183_v19 }
  0x37   :  { %2034 = vset.pattern.permute.xlu1 %v2126_v20  ;;  %2039 = vset.pattern.permute.xlu0 %v2127_v21 }
  0x38   :  { %110 = vperm.xlu1 %2034, %v2185_v3   ;;  %140 = vperm.xlu0 %2039, %v2185_v3  }
  0x39   :  { %1777 = vmatpush3.msra.mxu0 %v183_v19 }
  0x3a   :  { %1778 = vmatprep.subr.mxu0 %v182_v22 }
  0x3b   :  { %1779 = vmatpush3.msra.mxu0 %v182_v22 }
  0x3c   :  { %2035 = vset.pattern.permute.xlu1 %v2128_v24  ;;  %2042 = vset.pattern.permute.xlu0 %v2129_v25 }
  0x3d   :  { %116 = vperm.xlu1 %2035, %v2185_v3   ;;  %158 = vperm.xlu0 %2042, %v2185_v3  }
  0x3e   :  { %1780 = vmatprep.subr.mxu0 %v181_v23 }
  0x3f   :  { %1781 = vmatpush3.msra.mxu0 %v181_v23 }
  0x40   :  { %1782 = vmatprep.subr.mxu0 %v180_v26 }
  0x41   :  { %2037 = vset.pattern.permute.xlu1 %v2130_v28  ;;  %1783 = vmatpush3.msra.mxu0 %v180_v26 }
  0x42   :  { %128 = vperm.xlu1 %2037, %v2185_v3   ;;  %1784 = vmatprep.subr.mxu0 %v179_v27 }
  0x43   :  { %1785 = vmatpush3.msra.mxu0 %v179_v27  ;;  %2045 = vset.pattern.permute.xlu0 %v2117_v2  ;;  %v2283_v2 = vld [vmem:[%s2633_s2 + $0x48] sm:$0xff] }
  0x44   :  { %1786 = vmatprep.subr.mxu0 %v178_v29 }
  0x45   :  { %1787 = vmatpush3.msra.mxu0 %v178_v29 }
  0x46   :  { %2038 = vset.pattern.permute.xlu1 %v2131_v32  ;;  %1788 = vmatprep.subr.mxu0 %v177_v30 }
  0x47   :  { %134 = vperm.xlu1 %2038, %v2185_v3   ;;  %1789 = vmatpush3.msra.mxu0 %v177_v30 }
  0x48   :  { %1790 = vmatprep.subr.mxu0 %v176_v31 }
  0x49   :  { %1791 = vmatpush3.msra.mxu0 %v176_v31 }
  0x4a   :  { %1792 = vmatprep.subr.mxu0 %v175_v33 }
  0x4b   :  { %2040 = vset.pattern.permute.xlu1 %v2132_v34  ;;  %1793 = vmatpush3.msra.mxu0 %v175_v33  ;;  %v1571_v33 = vld [vmem:[%s2633_s2 + $0x78] sm:$0xff]  ;;  %v1570_v34 = vld [vmem:[%s2633_s2 + $0x70] sm:$0xff] }
  0x4c   :  { %146 = vperm.xlu1 %2040, %v2185_v3   ;;  %1888 = vmatprep.subr.mxu0 %v2263_v62 }
  0x50   :  { %2041 = vset.pattern.permute.xlu1 %v2133_v35  ;;  %v1569_v35 = vld [vmem:[%s2633_s2 + $0x68] sm:$0xff] }
  0x51   :  { %152 = vperm.xlu1 %2041, %v2185_v3  }
  0x55   :  { %2043 = vset.pattern.permute.xlu1 %v2134_v36  ;;  %v1568_v36 = vld [vmem:[%s2633_s2 + $0x60] sm:$0xff] }
  0x56   :  { %164 = vperm.xlu1 %2043, %v2185_v3  }
  0x5a   :  { %2044 = vset.pattern.permute.xlu1 %v2135_v38 }
  0x5b   :  { %170 = vperm.xlu1 %2044, %v2185_v3   ;;  %v1512_v3 = vld [vmem:[%s2633_s2 + $0x20] sm:$0xff] }
  0x5c   :  { %1830 = vmatprep.subr.mxu1 %v1512_v3 }
  0x5d   :  { %1831 = vmatpush3.msra.mxu1 %v1512_v3 }
  0x5e   :  { %1856 = vmatprep.subr.mxu1 %v359_v6 }
  0x9a   :  { %v69_v41 = vpop.permute.xlu1 %68  ;;  %v57_v42 = vpop.permute.xlu0 %56 }
  0x9b   :  { %vm58_vm0 = vcmp.eq.s32.totalorder %v57_v42, %v53_v40  ;;  %vm70_vm2 = vcmp.eq.s32.totalorder %v69_v41, %v53_v40  ;;  %v2137_v41 = vmov 0.0  }
  0x9c   :  { %1794 = vmatprep.mubr.msk.f32.mxu0 %vm58_vm0, %v2136_v43 }
  0x9f   :  { %v75_v44 = vpop.permute.xlu1 %74  ;;  %v63_v45 = vpop.permute.xlu0 %62 }
  0xa0   :  { %vm64_vm1 = vcmp.eq.s32.totalorder %v63_v45, %v53_v40  ;;  %vm76_vm3 = vcmp.eq.s32.totalorder %v75_v44, %v53_v40 }
  0xa1   :  { %1795 = vmatmul.mubr.msk.f32.vlgmr.msra.gmra.mxu0 %vm64_vm1, %v2136_v43 }
  0xa2   :  { %1797 = vmatprep.mubr.msk.f32.mxu0 %vm70_vm2, %v2136_v43  ;;  %1889 = vmatpush3.msra.mxu0 %v2263_v62 }
  0xa3   :  { %1890 = vmatprep.subr.mxu0 %v2273_v0 }
  0xa4   :  { %v81_v46 = vpop.permute.xlu1 %80  ;;  %v87_v47 = vpop.permute.xlu0 %86  ;;  %1891 = vmatpush3.msra.mxu0 %v2273_v0 }
  0xa5   :  { %vm82_vm4 = vcmp.eq.s32.totalorder %v81_v46, %v53_v40  ;;  %1798 = vmatmul.mubr.msk.f32.gmra.mxu0 %vm76_vm3, %v2136_v43  ;;  %vm88_vm5 = vcmp.eq.s32.totalorder %v87_v47, %v53_v40  ;;  %1892 = vmatprep.subr.mxu0 %v2283_v2 }
  0xa6   :  { %1800 = vmatprep.mubr.msk.f32.mxu0 %vm82_vm4, %v2136_v43  ;;  %1893 = vmatpush3.msra.mxu0 %v2283_v2  ;;  %vm365_vm4 = vcmask 261120  }
  0xa7   :  { %1894 = vmatprep.subr.mxu0 %v2293_v4 }
  0xa8   :  { %1895 = vmatpush3.msra.mxu0 %v2293_v4 }
  0xa9   :  { %v93_v48 = vpop.permute.xlu1 %92  ;;  %1801 = vmatmul.mubr.msk.f32.gmra.mxu0 %vm88_vm5, %v2136_v43  ;;  %v105_v49 = vpop.permute.xlu0 %104  ;;  %1952 = vmatprep.subr.mxu0 %v1591_v5  ;;  %vm2138_vm5 = vmmov 0  }
  0xaa   :  { %vm94_vm6 = vcmp.eq.s32.totalorder %v93_v48, %v53_v40  ;;  %vm106_vm7 = vcmp.eq.s32.totalorder %v105_v49, %v53_v40 }
  0xab   :  { %1803 = vmatprep.mubr.msk.f32.mxu0 %vm94_vm6, %v2136_v43  ;;  %vm1454_vm6 = vcmask 57344  }
  0xae   :  { %v99_v50 = vpop.permute.xlu1 %98  ;;  %v123_v52 = vpop.permute.xlu0 %122 }
  0xaf   :  { %vm100_vm8 = vcmp.eq.s32.totalorder %v99_v50, %v53_v40  ;;  %vm124_vm10 = vcmp.eq.s32.totalorder %v123_v52, %v53_v40 }
  0xb0   :  { %1804 = vmatmul.mubr.msk.f32.gmra.mxu0 %vm100_vm8, %v2136_v43 }
  0xb1   :  { %1806 = vmatprep.mubr.msk.f32.mxu0 %vm106_vm7, %v2136_v43 }
  0xb3   :  { %v111_v51 = vpop.permute.xlu1 %110  ;;  %v141_v55 = vpop.permute.xlu0 %140 }
  0xb4   :  { %vm112_vm9 = vcmp.eq.s32.totalorder %v111_v51, %v53_v40  ;;  %vm142_vm13 = vcmp.eq.s32.totalorder %v141_v55, %v53_v40 }
  0xb5   :  { %1807 = vmatmul.mubr.msk.f32.gmra.mxu0 %vm112_vm9, %v2136_v43 }
  0xb8   :  { %v117_v53 = vpop.permute.xlu1 %116  ;;  %v159_v58 = vpop.permute.xlu0 %158 }
  0xb9   :  { %vm118_vm11 = vcmp.eq.s32.totalorder %v117_v53, %v53_v40  ;;  %vm160_vm0 = vcmp.eq.s32.totalorder %v159_v58, %v53_v40 }
  0xba   :  { %1809 = vmatprep.mubr.msk.f32.mxu0 %vm118_vm11, %v2136_v43 }
  0xbb   :  { %1810 = vmatmul.mubr.msk.f32.gmra.mxu0 %vm124_vm10, %v2136_v43 }
  0xbd   :  { %v129_v54 = vpop.permute.xlu1 %128 }
  0xbe   :  { %vm130_vm12 = vcmp.eq.s32.totalorder %v129_v54, %v53_v40 }
  0xbf   :  { %1812 = vmatprep.mubr.msk.f32.mxu0 %vm130_vm12, %v2136_v43 }
  0xc2   :  { %v135_v56 = vpop.permute.xlu1 %134 }
  0xc3   :  { %vm136_vm14 = vcmp.eq.s32.totalorder %v135_v56, %v53_v40 }
  0xc4   :  { %1813 = vmatmul.mubr.msk.f32.gmra.mxu0 %vm136_vm14, %v2136_v43 }
  0xc5   :  { %1815 = vmatprep.mubr.msk.f32.mxu0 %vm142_vm13, %v2136_v43 }
  0xc7   :  { %v147_v57 = vpop.permute.xlu1 %146 }
  0xc8   :  { %vm148_vm15 = vcmp.eq.s32.totalorder %v147_v57, %v53_v40 }
  0xc9   :  { %1816 = vmatmul.mubr.msk.f32.gmra.mxu0 %vm148_vm15, %v2136_v43 }
  0xcc   :  { %v153_v59 = vpop.permute.xlu1 %152 }
  0xcd   :  { %vm154_vm1 = vcmp.eq.s32.totalorder %v153_v59, %v53_v40 }
  0xce   :  { %1818 = vmatprep.mubr.msk.f32.mxu0 %vm154_vm1, %v2136_v43 }
  0xcf   :  { %1819 = vmatmul.mubr.msk.f32.gmra.mxu0 %vm160_vm0, %v2136_v43 }
  0xd1   :  { %v165_v60 = vpop.permute.xlu1 %164 }
  0xd2   :  { %vm166_vm2 = vcmp.eq.s32.totalorder %v165_v60, %v53_v40 }
  0xd3   :  { %1821 = vmatprep.mubr.msk.f32.mxu0 %vm166_vm2, %v2136_v43 }
  0xd6   :  { %v171_v61 = vpop.permute.xlu1 %170 }
  0xd7   :  { %vm172_vm3 = vcmp.eq.s32.totalorder %v171_v61, %v53_v40 }
  0xd8   :  { %1822 = vmatmul.mubr.msk.f32.gmra.mxu0 %vm172_vm3, %v2136_v43  ;;  %v1374_v43 = vld [vmem:[#allocation2] sm:$0x1] }
  0xd9   :  { %1377 = vperm.xlu0 %2045, %v1374_v43  }
 0x161   :  { %v2303_v7 = vpop.f32.mrf.mxu0 }
 0x162   :  { %1832 = vmatprep.mubr.msk.f32.mxu1 %vm365_vm4, %v2303_v7 }
 0x163   :  { %v2307_v8 = vpop.f32.mrf.mxu0 }
 0x165   :  { %v2309_v9 = vpop.f32.mrf.mxu0 }
 0x167   :  { %v2311_v10 = vpop.f32.mrf.mxu0 }
 0x168   :  { %1833 = vmatmul.mubr.msk.f32.vlgmr.msra.gmra.mxu1 %vm365_vm4, %v2311_v10  ;;  %1896 = vmatprep.mubr.msk.f32.mxu0 %vm365_vm4, %v2311_v10 }
 0x169   :  { %1835 = vmatprep.mubr.msk.f32.mxu1 %vm365_vm4, %v2309_v9  ;;  %1897 = vmatmul.mubr.msk.f32.vlgmr.msra.gmra.mxu0 %vm365_vm4, %v2309_v9  ;;  %v2327_v13 = vpop.f32.mrf.mxu0 }
 0x16a   :  { %1953 = vmatpush3.msra.mxu0 %v1591_v5  ;;  %1857 = vmatpush3.msra.mxu1 %v359_v6 }
 0x16b   :  { %v2329_v14 = vpop.f32.mrf.mxu0  ;;  %1954 = vmatprep.subr.mxu0 %v1590_v11  ;;  %1858 = vmatprep.subr.mxu1 %v358_v12 }
 0x16c   :  { %1836 = vmatmul.mubr.msk.f32.gmra.mxu1 %vm365_vm4, %v2329_v14  ;;  %1899 = vmatprep.mubr.msk.f32.mxu0 %vm365_vm4, %v2329_v14 }
 0x16d   :  { %1900 = vmatmul.mubr.msk.f32.gmra.mxu0 %vm365_vm4, %v2327_v13  ;;  %1838 = vmatprep.mubr.msk.f32.mxu1 %vm365_vm4, %v2327_v13 }
 0x16e   :  { %1955 = vmatpush3.msra.mxu0 %v1590_v11  ;;  %1859 = vmatpush3.msra.mxu1 %v358_v12 }
 0x16f   :  { %1956 = vmatprep.subr.mxu0 %v1589_v15  ;;  %1860 = vmatprep.subr.mxu1 %v357_v16 }
 0x170   :  { %v2351_v19 = vpop.f32.mrf.mxu0  ;;  %1957 = vmatpush3.msra.mxu0 %v1589_v15  ;;  %1861 = vmatpush3.msra.mxu1 %v357_v16 }
 0x171   :  { %1958 = vmatprep.subr.mxu0 %v1588_v17  ;;  %1862 = vmatprep.subr.mxu1 %v356_v18 }
 0x172   :  { %v2353_v20 = vpop.f32.mrf.mxu0  ;;  %1959 = vmatpush3.msra.mxu0 %v1588_v17  ;;  %1863 = vmatpush3.msra.mxu1 %v356_v18 }
 0x173   :  { %1839 = vmatmul.mubr.msk.f32.gmra.mxu1 %vm365_vm4, %v2353_v20  ;;  %1902 = vmatprep.mubr.msk.f32.mxu0 %vm365_vm4, %v2353_v20 }
 0x174   :  { %1841 = vmatprep.mubr.msk.f32.mxu1 %vm365_vm4, %v2351_v19  ;;  %1903 = vmatmul.mubr.msk.f32.gmra.mxu0 %vm365_vm4, %v2351_v19 }
 0x175   :  { %v2363_v21 = vpop.f32.mrf.mxu0  ;;  %1989 = vmatprep.subr.mxu1 %v2263_v62 }
 0x177   :  { %v2366_v22 = vpop.f32.mrf.mxu0 }
 0x178   :  { %1842 = vmatmul.mubr.msk.f32.gmra.mxu1 %vm365_vm4, %v2366_v22  ;;  %1905 = vmatprep.mubr.msk.f32.mxu0 %vm365_vm4, %v2366_v22 }
 0x179   :  { %1844 = vmatprep.mubr.msk.f32.mxu1 %vm365_vm4, %v2363_v21  ;;  %1906 = vmatmul.mubr.msk.f32.gmra.mxu0 %vm365_vm4, %v2363_v21 }
 0x17b   :  { %v2376_v23 = vpop.f32.mrf.mxu0 }
 0x17d   :  { %v2378_v24 = vpop.f32.mrf.mxu0 }
 0x17e   :  { %1908 = vmatprep.mubr.msk.f32.mxu0 %vm365_vm4, %v2378_v24  ;;  %1845 = vmatmul.mubr.msk.f32.gmra.mxu1 %vm365_vm4, %v2378_v24 }
 0x17f   :  { %1909 = vmatmul.mubr.msk.f32.gmra.mxu0 %vm365_vm4, %v2376_v23  ;;  %1847 = vmatprep.mubr.msk.f32.mxu1 %vm365_vm4, %v2376_v23 }
 0x180   :  { %1960 = vmatprep.mubr.msk.f32.mxu0 %vm365_vm4, %v2329_v14 }
 0x183   :  { %1961 = vmatmul.mubr.msk.f32.vlgmr.msra.gmra.mxu0 %vm365_vm4, %v2327_v13 }
 0x184   :  { %v2392_v25 = vpop.f32.mrf.mxu0  ;;  %1963 = vmatprep.mubr.msk.f32.mxu0 %vm365_vm4, %v2353_v20 }
 0x186   :  { %v2396_v26 = vpop.f32.mrf.mxu0 }
 0x187   :  { %1848 = vmatmul.mubr.msk.f32.gmra.mxu1 %vm365_vm4, %v2396_v26  ;;  %1964 = vmatmul.mubr.msk.f32.gmra.mxu0 %vm365_vm4, %v2351_v19 }
 0x188   :  { %1850 = vmatprep.mubr.msk.f32.mxu1 %vm365_vm4, %v2392_v25  ;;  %1966 = vmatprep.mubr.msk.f32.mxu0 %vm365_vm4, %v2366_v22 }
 0x189   :  { %v2406_v27 = vpop.f32.mrf.mxu0 }
 0x18b   :  { %v2408_v28 = vpop.f32.mrf.mxu0  ;;  %1967 = vmatmul.mubr.msk.f32.gmra.mxu0 %vm365_vm4, %v2363_v21 }
 0x18c   :  { %1851 = vmatmul.mubr.msk.f32.gmra.mxu1 %vm365_vm4, %v2408_v28  ;;  %1969 = vmatprep.mubr.msk.f32.mxu0 %vm365_vm4, %v2378_v24 }
 0x18d   :  { %1853 = vmatprep.mubr.msk.f32.mxu1 %vm365_vm4, %v2406_v27 }
 0x18f   :  { %v2418_v29 = vpop.f32.mrf.mxu0  ;;  %1970 = vmatmul.mubr.msk.f32.gmra.mxu0 %vm365_vm4, %v2376_v23 }
 0x190   :  { %1972 = vmatprep.mubr.msk.f32.mxu0 %vm365_vm4, %v2396_v26 }
 0x191   :  { %v2424_v30 = vpop.f32.mrf.mxu0 }
 0x192   :  { %1854 = vmatmul.mubr.msk.f32.gmra.mxu1 %vm365_vm4, %v2424_v30 }
 0x193   :  { %1864 = vmatprep.mubr.msk.f32.mxu1 %vm365_vm4, %v2307_v8  ;;  %1973 = vmatmul.mubr.msk.f32.gmra.mxu0 %vm365_vm4, %v2392_v25 }
 0x194   :  { %1975 = vmatprep.mubr.msk.f32.mxu0 %vm365_vm4, %v2408_v28 }
 0x196   :  { %1865 = vmatmul.mubr.msk.f32.vlgmr.msra.gmra.mxu1 %vm365_vm4, %v2303_v7 }
 0x197   :  { %1867 = vmatprep.mubr.msk.f32.mxu1 %vm365_vm4, %v2311_v10  ;;  %1976 = vmatmul.mubr.msk.f32.gmra.mxu0 %vm365_vm4, %v2406_v27 }
 0x198   :  { %1978 = vmatprep.mubr.msk.f32.mxu0 %vm365_vm4, %v2424_v30  ;;  %1993 = vmatpush3.msra.mxu1 %v2263_v62  ;;  %v1823_v31 = vpop.f32.mrf.mxu0 }
 0x199   :  { %1990 = vmatprep.subr.mxu1 %v2273_v0 }
 0x19a   :  { %1868 = vmatmul.mubr.msk.f32.gmra.mxu1 %vm365_vm4, %v2309_v9  ;;  %v347_v32 = vpop.f32.mrf.mxu0 }
 0x19b   :  { %1870 = vmatprep.mubr.msk.f32.mxu1 %vm365_vm4, %v2329_v14  ;;  %1979 = vmatmul.mubr.msk.f32.gmra.mxu0 %vm365_vm4, %v2418_v29 }
 0x19c   :  { %1994 = vmatpush3.msra.mxu1 %v2273_v0  ;;  %1981 = vmatprep.mubr.msk.f32.mxu0 %vm365_vm4, %v347_v32 }
 0x19d   :  { %1991 = vmatprep.subr.mxu1 %v2283_v2 }
 0x19e   :  { %1871 = vmatmul.mubr.msk.f32.gmra.mxu1 %vm365_vm4, %v2327_v13 }
 0x19f   :  { %1873 = vmatprep.mubr.msk.f32.mxu1 %vm365_vm4, %v2353_v20  ;;  %1995 = vmatpush3.msra.mxu1 %v2283_v2 }
 0x1a0   :  { %1992 = vmatprep.subr.mxu1 %v2293_v4  ;;  %1982 = vmatmul.mubr.msk.f32.gmra.mxu0 %vm365_vm4, %v1823_v31 }
 0x1a1   :  { %1996 = vmatpush3.msra.mxu1 %v2293_v4 }
 0x1a2   :  { %1874 = vmatmul.mubr.msk.f32.gmra.mxu1 %vm365_vm4, %v2351_v19  ;;  %1920 = vmatprep.subr.mxu1 %v1571_v33 }
 0x1a3   :  { %1876 = vmatprep.mubr.msk.f32.mxu1 %vm365_vm4, %v2366_v22 }
 0x1a6   :  { %1877 = vmatmul.mubr.msk.f32.gmra.mxu1 %vm365_vm4, %v2363_v21 }
 0x1a7   :  { %1879 = vmatprep.mubr.msk.f32.mxu1 %vm365_vm4, %v2378_v24 }
 0x1aa   :  { %1880 = vmatmul.mubr.msk.f32.gmra.mxu1 %vm365_vm4, %v2376_v23 }
 0x1ab   :  { %1882 = vmatprep.mubr.msk.f32.mxu1 %vm365_vm4, %v2396_v26 }
 0x1ae   :  { %1883 = vmatmul.mubr.msk.f32.gmra.mxu1 %vm365_vm4, %v2392_v25 }
 0x1af   :  { %1885 = vmatprep.mubr.msk.f32.mxu1 %vm365_vm4, %v2408_v28 }
 0x1b2   :  { %1886 = vmatmul.mubr.msk.f32.gmra.mxu1 %vm365_vm4, %v2406_v27 }
 0x1b3   :  { %1911 = vmatprep.mubr.msk.f32.mxu1 %vm365_vm4, %v2396_v26 }
 0x1b6   :  { %1912 = vmatmul.mubr.msk.f32.vlgmr.msra.gmra.mxu1 %vm365_vm4, %v2392_v25 }
 0x1b7   :  { %1914 = vmatprep.mubr.msk.f32.mxu1 %vm365_vm4, %v2408_v28  ;;  %1921 = vmatpush3.msra.mxu1 %v1571_v33 }
 0x1b8   :  { %1922 = vmatprep.subr.mxu1 %v1570_v34 }
 0x1b9   :  { %1923 = vmatpush3.msra.mxu1 %v1570_v34 }
 0x1ba   :  { %1915 = vmatmul.mubr.msk.f32.gmra.mxu1 %vm365_vm4, %v2406_v27  ;;  %1924 = vmatprep.subr.mxu1 %v1569_v35 }
 0x1bb   :  { %1917 = vmatprep.mubr.msk.f32.mxu1 %vm365_vm4, %v2424_v30  ;;  %1925 = vmatpush3.msra.mxu1 %v1569_v35 }
 0x1bc   :  { %1926 = vmatprep.subr.mxu1 %v1568_v36 }
 0x1bd   :  { %1927 = vmatpush3.msra.mxu1 %v1568_v36 }
 0x1be   :  { %1918 = vmatmul.mubr.msk.f32.gmra.mxu1 %vm365_vm4, %v2418_v29  ;;  %1984 = vmatprep.subr.mxu1 %v2137_v41 }
 0x1bf   :  { %1928 = vmatprep.mubr.msk.f32.mxu1 %vm365_vm4, %v2309_v9 }
 0x1c2   :  { %1929 = vmatmul.mubr.msk.f32.vlgmr.msra.gmra.mxu1 %vm365_vm4, %v2329_v14 }
 0x1c3   :  { %1931 = vmatprep.mubr.msk.f32.mxu1 %vm365_vm4, %v2327_v13 }
 0x1c6   :  { %1932 = vmatmul.mubr.msk.f32.gmra.mxu1 %vm365_vm4, %v2353_v20 }
 0x1c7   :  { %1934 = vmatprep.mubr.msk.f32.mxu1 %vm365_vm4, %v2351_v19 }
 0x1ca   :  { %1935 = vmatmul.mubr.msk.f32.gmra.mxu1 %vm365_vm4, %v2366_v22 }
 0x1cb   :  { %1937 = vmatprep.mubr.msk.f32.mxu1 %vm365_vm4, %v2363_v21 }
 0x1ce   :  { %1938 = vmatmul.mubr.msk.f32.gmra.mxu1 %vm365_vm4, %v2378_v24 }
 0x1cf   :  { %1940 = vmatprep.mubr.msk.f32.mxu1 %vm365_vm4, %v2376_v23 }
 0x1d2   :  { %1941 = vmatmul.mubr.msk.f32.gmra.mxu1 %vm365_vm4, %v2396_v26 }
 0x1d3   :  { %1943 = vmatprep.mubr.msk.f32.mxu1 %vm365_vm4, %v2392_v25 }
 0x1d6   :  { %1944 = vmatmul.mubr.msk.f32.gmra.mxu1 %vm365_vm4, %v2408_v28 }
 0x1d7   :  { %1946 = vmatprep.mubr.msk.f32.mxu1 %vm365_vm4, %v2406_v27 }
 0x1da   :  { %1947 = vmatmul.mubr.msk.f32.gmra.mxu1 %vm365_vm4, %v2424_v30 }
 0x1db   :  { %1949 = vmatprep.mubr.msk.f32.mxu1 %vm365_vm4, %v2418_v29 }
 0x1de   :  { %1950 = vmatmul.mubr.msk.f32.gmra.mxu1 %vm365_vm4, %v347_v32 }
 0x1df   :  { %1986 = vmatprep.mubr.msk.f32.mxu1 %vm2138_vm5, %v2137_v41 }
 0x228   :  { %v1834_v37 = vpop.f32.mrf.mxu1 }
 0x229   :  { %v1898_v50 = vpop.f32.mrf.mxu0 }
 0x22a   :  { %v480_v38 = vpop.f32.mrf.mxu1 }
 0x22b   :  { %v781_v52 = vpop.f32.mrf.mxu0 }
 0x22c   :  { %v1837_v40 = vpop.f32.mrf.mxu1 }
 0x22d   :  { %v1901_v54 = vpop.f32.mrf.mxu0 }
 0x22e   :  { %v490_v42 = vpop.f32.mrf.mxu1 }
 0x22f   :  { %v791_v56 = vpop.f32.mrf.mxu0 }
 0x233   :  { %v1840_v44 = vpop.f32.mrf.mxu1 }
 0x234   :  { %v1904_v58 = vpop.f32.mrf.mxu0 }
 0x235   :  { %v2534_v45 = vpop.f32.mrf.mxu1 }
 0x236   :  { %v2556_v61 = vpop.f32.mrf.mxu0 }
 0x238   :  { %v2536_v46 = vpop.f32.mrf.mxu1 }
 0x239   :  { %v2558_v2 = vpop.f32.mrf.mxu0 }
 0x23a   :  { %v2538_v47 = vpop.f32.mrf.mxu1 }
 0x23b   :  { %v2560_v5 = vpop.f32.mrf.mxu0 }
 0x23e   :  { %v2540_v48 = vpop.f32.mrf.mxu1 }
 0x23f   :  { %v2562_v7 = vpop.f32.mrf.mxu0 }
 0x240   :  { %v2542_v49 = vpop.f32.mrf.mxu1 }
 0x241   :  { %v2564_v10 = vpop.f32.mrf.mxu0 }
 0x243   :  { %v1962_v13 = vpop.f32.mrf.mxu0 }
 0x245   :  { %v1119_v16 = vpop.f32.mrf.mxu0 }
 0x247   :  { %v2544_v51 = vpop.f32.mrf.mxu1  ;;  %v1965_v19 = vpop.f32.mrf.mxu0 }
 0x249   :  { %v2546_v53 = vpop.f32.mrf.mxu1  ;;  %v1129_v22 = vpop.f32.mrf.mxu0 }
 0x24b   :  { %v1968_v25 = vpop.f32.mrf.mxu0 }
 0x24c   :  { %v2548_v55 = vpop.f32.mrf.mxu1 }
 0x24d   :  { %v1139_v28 = vpop.f32.mrf.mxu0 }
 0x24e   :  { %v2550_v57 = vpop.f32.mrf.mxu1 }
 0x24f   :  { %v1971_v31 = vpop.f32.mrf.mxu0 }
 0x251   :  { %v2590_v36 = vpop.f32.mrf.mxu0 }
 0x252   :  { %v2552_v59 = vpop.f32.mrf.mxu1 }
 0x254   :  { %v2554_v60 = vpop.f32.mrf.mxu1 }
 0x255   :  { %2639 = vst [vmem:[#allocation12_spill] sm:$0xff] %v2554_v60  ;;  %v2593_v60 = vpop.f32.mrf.mxu0 }
 0x256   :  { %v1866_v62 = vpop.f32.mrf.mxu1 }
 0x257   :  { %v634_v63 = vadd.f32 %v1866_v62, %v1834_v37 }
 0x258   :  { %v628_v0 = vpop.f32.mrf.mxu1 }
 0x259   :  { %v629_v1 = vadd.f32 %v628_v0, %v480_v38  ;;  %v861_v34 = vadd.f32 %v1898_v50, %v634_v63  ;;  %v1609_v63 = vld [vmem:[#allocation6 + $0x1] ss:$0 sm:$0xff] }
 0x25a   :  { %v1869_v3 = vpop.f32.mrf.mxu1 }
 0x25b   :  { %v644_v33 = vadd.f32 %v1869_v3, %v1837_v40  ;;  %v860_v41 = vadd.f32 %v781_v52, %v629_v1  ;;  %v1608_v1 = vld [vmem:[#allocation6] ss:$0 sm:$0xff] }
 0x25c   :  { %v638_v4 = vpop.f32.mrf.mxu1 }
 0x25d   :  { %v639_v37 = vadd.f32 %v638_v4, %v490_v42  ;;  %v863_v39 = vadd.f32 %v1901_v54, %v644_v33  ;;  %v1611_v33 = vld [vmem:[#allocation6 + $0x3] ss:$0 sm:$0xff] }
 0x25e   :  { %v1872_v6 = vpop.f32.mrf.mxu1 }
 0x25f   :  { %v654_v62 = vadd.f32 %v1872_v6, %v1840_v44 }
 0x260   :  { %v648_v8 = vpop.f32.mrf.mxu1 }
 0x261   :  { %v865_v3 = vadd.f32 %v1904_v58, %v654_v62 }
 0x262   :  { %v1875_v9 = vpop.f32.mrf.mxu1 }
 0x263   :  { %v664_v50 = vadd.f32 %v1875_v9, %v2536_v46 }
 0x264   :  { %v658_v11 = vpop.f32.mrf.mxu1 }
 0x265   :  { %v659_v44 = vadd.f32 %v658_v11, %v2538_v47  ;;  %v867_v58 = vadd.f32 %v2558_v2, %v664_v50  ;;  %v1612_v11 = vld [vmem:[#allocation6 + $0x4] ss:$0 sm:$0xff] }
 0x266   :  { %v1878_v12 = vpop.f32.mrf.mxu1 }
 0x268   :  { %v668_v14 = vpop.f32.mrf.mxu1 }
 0x26a   :  { %v2566_v15 = vpop.f32.mrf.mxu1 }
 0x26c   :  { %v2568_v17 = vpop.f32.mrf.mxu1 }
 0x26e   :  { %v2570_v18 = vpop.f32.mrf.mxu1 }
 0x270   :  { %v2572_v20 = vpop.f32.mrf.mxu1 }
 0x272   :  { %v2574_v21 = vpop.f32.mrf.mxu1 }
 0x273   :  { %2640 = vst [vmem:[#allocation13_spill] sm:$0xff] %v2574_v21 }
 0x274   :  { %v2576_v23 = vpop.f32.mrf.mxu1 }
 0x275   :  { %2641 = vst [vmem:[#allocation14_spill] sm:$0xff] %v2576_v23 }
 0x276   :  { %v2578_v24 = vpop.f32.mrf.mxu1 }
 0x278   :  { %v2580_v26 = vpop.f32.mrf.mxu1 }
 0x27a   :  { %v2582_v27 = vpop.f32.mrf.mxu1 }
 0x27c   :  { %v2584_v29 = vpop.f32.mrf.mxu1 }
 0x27d   :  { %2642 = vst [vmem:[#allocation15_spill] sm:$0xff] %v2584_v29  ;;  %v649_v29 = vadd.f32 %v648_v8, %v2534_v45  ;;  %v1159_v45 = vpop.f32.mrf.mxu0  ;;  %v674_v8 = vadd.f32 %v1878_v12, %v2540_v48  ;;  %v866_v48 = vadd.f32 %v2560_v5, %v659_v44 }
 0x27e   :  { %v2586_v30 = vpop.f32.mrf.mxu1 }
 0x27f   :  { %2643 = vst [vmem:[#allocation16_spill] sm:$0xff] %v2586_v30  ;;  %v864_v6 = vadd.f32 %v2556_v61, %v649_v29  ;;  %v1977_v12 = vpop.f32.mrf.mxu0 }
 0x280   :  { %v2588_v32 = vpop.f32.mrf.mxu1 }
 0x281   :  { %2644 = vst [vmem:[#allocation17_spill] sm:$0xff] %v2588_v32  ;;  %v862_v32 = vadd.f32 %v791_v56, %v639_v37  ;;  %v1613_v56 = vld [vmem:[#allocation6 + $0x5] ss:$0 sm:$0xff] }
 0x282   :  { %v1930_v35 = vpop.f32.mrf.mxu1 }
 0x283   :  { %v1030_v38 = vadd.f32 %v1930_v35, %v861_v34  ;;  %v1610_v35 = vld [vmem:[#allocation6 + $0x2] ss:$0 sm:$0xff] }
 0x284   :  { %v950_v43 = vpop.f32.mrf.mxu1 }
 0x285   :  { %v1029_v0 = vadd.f32 %v950_v43, %v860_v41  ;;  %v1199_v30 = vadd.f32 %v1962_v13, %v1030_v38  ;;  %v869_v38 = vadd.f32 %v2562_v7, %v674_v8  ;;  %v679_v7 = vadd.f32 %v2568_v17, %v2546_v53 }
 0x286   :  { %v1933_v23 = vpop.f32.mrf.mxu1 }
 0x287   :  { %v1032_v21 = vadd.f32 %v1933_v23, %v863_v39  ;;  %v1198_v42 = vadd.f32 %v1119_v16, %v1029_v0  ;;  %v1327_v13 = vadd.f32 %v1609_v63, %v1199_v30  ;;  %v669_v16 = vadd.f32 %v668_v14, %v2542_v49  ;;  %v1615_v30 = vld [vmem:[#allocation6 + $0x7] ss:$0 sm:$0xff] }
 0x288   :  { %v960_v40 = vpop.f32.mrf.mxu1  ;;  %v870_v8 = vadd.f32 %v2580_v26, %v679_v7  ;;  %v689_v26 = vadd.f32 %v2572_v20, %v2550_v57  ;;  %v1621_v57 = vld [vmem:[#allocation6 + $0xd] ss:$0 sm:$0xff] }
 0x289   :  { %v1031_v4 = vadd.f32 %v960_v40, %v862_v32  ;;  %v1201_v39 = vadd.f32 %v1965_v19, %v1032_v21  ;;  %v1326_v32 = vadd.f32 %v1608_v1, %v1198_v42  ;;  %v1343_v19 = vmax.f32 %v1327_v13, 0.0  ;;  %v1169_v42 = vpop.f32.mrf.mxu0 }
 0x28a   :  { %v1936_v52 = vpop.f32.mrf.mxu1  ;;  %v868_v5 = vadd.f32 %v2564_v10, %v669_v16  ;;  %v694_v10 = vadd.f32 %v2570_v18, %v2548_v55 }
 0x28b   :  { %v1034_v54 = vadd.f32 %v1936_v52, %v865_v3  ;;  %v1200_v47 = vadd.f32 %v1129_v22, %v1031_v4  ;;  %v1329_v21 = vadd.f32 %v1611_v33, %v1201_v39  ;;  %v684_v22 = vadd.f32 %v2566_v15, %v2544_v51  ;;  %v1616_v39 = vld [vmem:[#allocation6 + $0x8] ss:$0 sm:$0xff]  ;;  %v1980_v33 = vpop.f32.mrf.mxu0 }
 0x28c   :  { %v970_v23 = vpop.f32.mrf.mxu1  ;;  %v1342_v43 = vmax.f32 %v1326_v32, 0.0 }
 0x28d   :  { %v1203_v46 = vadd.f32 %v1968_v25, %v1034_v54  ;;  %v1033_v9 = vadd.f32 %v970_v23, %v864_v6  ;;  %v1328_v62 = vadd.f32 %v1610_v35, %v1200_v47  ;;  %v1345_v4 = vmax.f32 %v1329_v21, 0.0  ;;  %v1617_v54 = vld [vmem:[#allocation6 + $0x9] ss:$0 sm:$0xff]  ;;  %v1618_v35 = vld [vmem:[#allocation6 + $0xa] ss:$0 sm:$0xff] }
 0x28e   :  { %v1939_v34 = vpop.f32.mrf.mxu1  ;;  %v2647_v21 = vld [vmem:[#allocation14_spill] sm:$0xff] }
 0x28f   :  { %v1331_v61 = vadd.f32 %v1613_v56, %v1203_v46  ;;  %v1202_v29 = vadd.f32 %v1139_v28, %v1033_v9  ;;  %v1036_v37 = vadd.f32 %v1939_v34, %v867_v58  ;;  %v1614_v28 = vld [vmem:[#allocation6 + $0x6] ss:$0 sm:$0xff]  ;;  %v873_v46 = vadd.f32 %v2582_v27, %v694_v10  ;;  %v1619_v58 = vld [vmem:[#allocation6 + $0xb] ss:$0 sm:$0xff] }
 0x290   :  { %v980_v25 = vpop.f32.mrf.mxu1 }
 0x291   :  { %v1347_v2 = vmax.f32 %v1331_v61, 0.0  ;;  %v1330_v41 = vadd.f32 %v1612_v11, %v1202_v29  ;;  %v1205_v49 = vadd.f32 %v1971_v31, %v1036_v37  ;;  %v1035_v14 = vadd.f32 %v980_v25, %v866_v48  ;;  %v1179_v48 = vpop.f32.mrf.mxu0  ;;  %v2648_v25 = vld [vmem:[#allocation15_spill] sm:$0xff] }
 0x292   :  { %v1942_v0 = vpop.f32.mrf.mxu1  ;;  %v871_v31 = vadd.f32 %v2578_v24, %v684_v22 }
 0x293   :  { %v1359_v40 = vmax.f32 %v1343_v19, %v1347_v2  ;;  %v1346_v50 = vmax.f32 %v1330_v41, 0.0  ;;  %v1333_v63 = vadd.f32 %v1615_v30, %v1205_v49  ;;  %v1204_v3 = vadd.f32 %v2590_v36, %v1035_v14  ;;  %v2646_v19 = vld [vmem:[#allocation12_spill] sm:$0xff] }
 0x294   :  { %v1038_v52 = vadd.f32 %v1942_v0, %v869_v38  ;;  %v990_v51 = vpop.f32.mrf.mxu1  ;;  %v1344_v36 = vmax.f32 %v1328_v62, 0.0  ;;  %v699_v30 = vadd.f32 %v2647_v21, %v2646_v19  ;;  %v2649_v38 = vld [vmem:[#allocation16_spill] sm:$0xff] }
 0x295   :  { %v1358_v15 = vmax.f32 %v1342_v43, %v1346_v50  ;;  %v1349_v44 = vmax.f32 %v1333_v63, 0.0  ;;  %v1332_v1 = vadd.f32 %v1614_v28, %v1204_v3  ;;  %v1037_v6 = vadd.f32 %v990_v51, %v868_v5  ;;  %v2650_v43 = vld [vmem:[#allocation17_spill] sm:$0xff]  ;;  %v1983_v28 = vpop.f32.mrf.mxu0 }
 0x296   :  { %v1207_v13 = vadd.f32 %v2593_v60, %v1038_v52  ;;  %v1945_v53 = vpop.f32.mrf.mxu1  ;;  %v2645_v60 = vld [vmem:[#allocation13_spill] sm:$0xff]  ;;  %v874_v62 = vadd.f32 %v2650_v43, %v699_v30 }
 0x297   :  { %v1361_v17 = vmax.f32 %v1345_v4, %v1349_v44  ;;  %v1348_v24 = vmax.f32 %v1332_v1, 0.0  ;;  %v1206_v56 = vadd.f32 %v1159_v45, %v1037_v6  ;;  %v1040_v23 = vadd.f32 %v1945_v53, %v871_v31  ;;  %v1623_v4 = vld [vmem:[#allocation6 + $0xf] ss:$0 sm:$0xff]  ;;  %v1622_v6 = vld [vmem:[#allocation6 + $0xe] ss:$0 sm:$0xff] }
 0x298   :  { %v1335_v9 = vadd.f32 %v1617_v54, %v1207_v13  ;;  %v1000_v16 = vpop.f32.mrf.mxu1  ;;  %v704_v11 = vadd.f32 %v2645_v60, %v2552_v59  ;;  %v1189_v54 = vpop.f32.mrf.mxu0 }
 0x299   :  { %v1360_v32 = vmax.f32 %v1344_v36, %v1348_v24  ;;  %v1334_v47 = vadd.f32 %v1616_v39, %v1206_v56  ;;  %v1209_v55 = vadd.f32 %v1977_v12, %v1040_v23  ;;  %v1039_v18 = vadd.f32 %v1000_v16, %v870_v8 }
 0x29a   :  { %v1351_v34 = vmax.f32 %v1335_v9, 0.0  ;;  %v1948_v45 = vpop.f32.mrf.mxu1  ;;  %v872_v12 = vadd.f32 %v2648_v25, %v689_v26  ;;  %v875_v2 = vadd.f32 %v2649_v38, %v704_v11  ;;  %v2651_v16 = vlaneseq }
 0x29b   :  { %v1350_v61 = vmax.f32 %v1334_v47, 0.0  ;;  %v1337_v29 = vadd.f32 %v1619_v58, %v1209_v55  ;;  %v1208_v37 = vadd.f32 %v1169_v42, %v1039_v18  ;;  %v1042_v27 = vadd.f32 %v1948_v45, %v873_v46  ;;  %v1620_v42 = vld [vmem:[#allocation6 + $0xc] ss:$0 sm:$0xff]  ;;  %v1373_v58 = vld [vmem:[%s2635_s4] sm:$0x1]  ;;  %v1378_v55 = vpop.permute.xlu0 %1377 }
 0x29c   :  { %v1363_v41 = vmax.f32 %v1359_v40, %v1351_v34  ;;  %v1010_v20 = vpop.f32.mrf.mxu1 }
 0x29d   :  { %v1362_v49 = vmax.f32 %v1358_v15, %v1350_v61  ;;  %v1353_v59 = vmax.f32 %v1337_v29, 0.0  ;;  %v1336_v14 = vadd.f32 %v1618_v35, %v1208_v37  ;;  %v1211_v22 = vadd.f32 %v1980_v33, %v1042_v27 }
 0x29e   :  { %v1041_v0 = vadd.f32 %v1010_v20, %v872_v12  ;;  %v1951_v5 = vpop.f32.mrf.mxu1 }
 0x29f   :  { %v1365_v50 = vmax.f32 %v1361_v17, %v1353_v59  ;;  %v1352_v63 = vmax.f32 %v1336_v14, 0.0  ;;  %v1339_v3 = vadd.f32 %v1621_v57, %v1211_v22  ;;  %v1044_v7 = vadd.f32 %v1951_v5, %v875_v2 }
 0x2a0   :  { %v1210_v31 = vadd.f32 %v1179_v48, %v1041_v0  ;;  %v1020_v52 = vpop.f32.mrf.mxu1 }
 0x2a1   :  { %v1364_v40 = vmax.f32 %v1360_v32, %v1352_v63  ;;  %v1355_v51 = vmax.f32 %v1339_v3, 0.0  ;;  %v1213_v44 = vadd.f32 %v1983_v28, %v1044_v7  ;;  %v1043_v15 = vadd.f32 %v1020_v52, %v874_v62 }
 0x2a2   :  { %v1338_v1 = vadd.f32 %v1620_v42, %v1210_v31  ;;  %v1381_v32 = vshrl.u32 %v2651_v16, 7 }
 0x2a3   :  { %v1367_v10 = vmax.f32 %v1363_v41, %v1355_v51  ;;  %v1341_v8 = vadd.f32 %v1623_v4, %v1213_v44  ;;  %v1212_v36 = vadd.f32 %v1189_v54, %v1043_v15 }
 0x2a4   :  { %v1354_v13 = vmax.f32 %v1338_v1, 0.0  ;;  %v1382_v47 = vsub.s32 0, %v1381_v32 }
 0x2a5   :  { %v1357_v39 = vmax.f32 %v1341_v8, 0.0  ;;  %v1340_v53 = vadd.f32 %v1622_v6, %v1212_v36 }
 0x2a6   :  { %v1366_v17 = vmax.f32 %v1362_v49, %v1354_v13  ;;  %v1383_v18 = vrot.slane %v1378_v55, %v1382_v47 }
 0x2a7   :  { %v1369_v24 = vmax.f32 %v1365_v50, %v1357_v39  ;;  %v1356_v56 = vmax.f32 %v1340_v53, 0.0 }
 0x2a8   :  { %v1370_v23 = vmax.f32 %v1366_v17, %v1367_v10 }
 0x2a9   :  { %v1368_v33 = vmax.f32 %v1364_v40, %v1356_v56 }
 0x2ab   :  { %v1371_v46 = vmax.f32 %v1368_v33, %v1369_v24 }
 0x2ad   :  { %v1372_v9 = vmax.f32 %v1370_v23, %v1371_v46 }
 0x2af   :  { %1985 = vmatpush3.xpose.msra.mxu1 %v1372_v9 }
 0x2b2   :  { %1987 = vmatmul.mubr.f32.vlgmr.msra.gmra.mxu1 %v1373_v58 }
 0x372   :  { %v1450_v26 = vpop.f32.mrf.mxu1 }
 0x373   :  { %v1451_v60 = vadd.f32 %v1450_v26, %v1383_v18 }
 0x374   :  { %v1988_v11 = vpop.f32.mrf.mxu1 }
 0x375   :  { %1455 = vst.msk [vmem:[#allocation8] sm:$0x1] %vm1454_vm6, %v1451_v60 }
 0x376   :  { %2097 = shalt.err (!%p2094_p0)
}
 0x377   :  { %1465 = dma.vmem_to_hbm [thread:$0]  %s1463_s26, 16, %s2637_s6, [#allocation5]  }
 0x378   :  { %2110 = dma.done.wait [#allocation5], 16  }
 0x379   :  { %2111 = vsyncadd [#allocation5], 4294967280 }
 0x37a   :  { %1469 = vsyncpa [#allocation4], 1 }
 0x37b   :  { %1470 = vsyncpa [#allocation7], 1 }
 0x37c   :  { %1471 = vsyncpa [#allocation5], 1 }

</bundles_post_ra>
